<compile_context>
chip_gen: v5e
topology: v5e:2x2
jax: 0.10.0
libtpu: 0.0.40
codegen_flags: <defaults>
</compile_context>

<pallas_src>
import functools
import math

import jax
import jax.numpy as jnp
from jax.experimental import pallas as pl
from jax.experimental.pallas import tpu as pltpu


def _round_up(x, m):
    return (x + m - 1) // m * m


def _cdiv(a, b):
    return (a + b - 1) // b


def _vmem_capacity_bytes():
    """Physical VMEM per core, generation aware (v5e/v6e 128 MiB, v7x 64 MiB)."""
    try:
        info = pltpu.get_tpu_info()
        cap = getattr(info, "vmem_capacity_bytes", None)
        if callable(cap):
            cap = cap()
        if cap:
            return int(cap)
    except Exception:
        pass
    return 64 << 20  # conservative fallback (v7x per-TensorCore)


def _vmem_tile_bytes(rows, cols, itemsize):
    # Account for Mosaic's internal (8, 128) layout padding.
    return _round_up(max(rows, 1), 8) * _round_up(max(cols, 1), 128) * itemsize


def _fused_attention_kernel(qx_ref, wq_ref, bq_ref, sx_ref, wk_ref, bk_ref,
                            vals_ref, out_ref, keys_ref, *, scale):
    """query-projection -> logits -> softmax -> p @ V, keys cached in scratch."""
    # key_module(search_x): computed once per core (inner "arbitrary" axis is
    # never split across cores, so every core hits inner step 0 first); the
    # VMEM scratch persists across grid steps.
    @pl.when(pl.program_id(1) == 0)
    def _():
        k = jnp.dot(sx_ref[...], wk_ref[...],
                    preferred_element_type=jnp.float32)            # (S, Dk)
        keys_ref[...] = (k + bk_ref[...]).astype(keys_ref.dtype)

    # query_module(query_x) for this batch tile (f32 accumulation + bias).
    qkeys = jnp.dot(qx_ref[...], wq_ref[...],
                    preferred_element_type=jnp.float32) + bq_ref[...]  # (TB, Dk)
    qkeys = qkeys.astype(keys_ref.dtype)

    # logits[b, s] = <qkeys[b, :], keys[s, :]> * 1/sqrt(Dk)
    # Contraction on the last dim of BOTH operands (A @ B^T, MXU-native).
    logits = jax.lax.dot_general(
        qkeys, keys_ref[...],
        dimension_numbers=(((1,), (1,)), ((), ())),
        preferred_element_type=jnp.float32) * scale                 # (TB, S)

    # softmax over the search axis (f32).
    # TODO(synk): on v6e/v7x a bf16 exp roughly doubles EUP throughput when
    # the softmax exp is the binding slot (keep the sum / reciprocal in f32).
    m = jnp.max(logits, axis=-1, keepdims=True)
    e = jnp.exp(logits - m)
    l = jnp.sum(e, axis=-1, keepdims=True)
    r = pl.reciprocal(l, approx=True)          # EUP slot (essentially free)
    r = r * (2.0 - l * r)                      # one Newton step -> f32 accuracy
    p = e * r                                  # (TB, S)

    # res[b, :] = sum_s p[b, s] * values[s, :]
    out_ref[...] = jnp.dot(p.astype(vals_ref.dtype), vals_ref[...],
                           preferred_element_type=jnp.float32)      # (TB, Dv)


def make_transformer_forward(search_x, search_y, wq, bq, wk, bk, *,
                             matmul_dtype=None, max_batch_tile=128,
                             interpret=False):
    """Prepare the static operands once and return `forward(query_x)`.

    Returns a callable producing (B, n_keys=1, D_val) float32, matching the
    PyTorch module with mask=None, soft_mask=None, flatten=False and a noop
    value_module.

    matmul_dtype: optionally jnp.bfloat16 to feed the MXU bf16 operands on
    v6e/v7x production shapes (accumulation / softmax stay f32; on v5e keep
    element-wise math f32 -- only the matmul operands are cast).
    """
    search_x = jnp.asarray(search_x, jnp.float32)
    search_y = jnp.asarray(search_y, jnp.float32)
    wq = jnp.asarray(wq, jnp.float32)
    wk = jnp.asarray(wk, jnp.float32)
    bq = jnp.asarray(bq, jnp.float32)
    bk = jnp.asarray(bk, jnp.float32)

    S, Din = search_x.shape
    Dv = search_y.shape[-1]
    Dk = wq.shape[-1]

    compute_dtype = jnp.float32 if matmul_dtype is None else matmul_dtype
    itemsize = jnp.dtype(compute_dtype).itemsize

    # Static operands cast/reshaped ONCE (hoisted out of the per-call path).
    sx_c = search_x.astype(compute_dtype)            # (S, Din)
    vy_c = search_y.astype(compute_dtype)            # (S, Dv)
    wq_c = wq.astype(compute_dtype)                  # (Din, Dk)
    wk_c = wk.astype(compute_dtype)                  # (Din, Dk)
    bq_r = bq.reshape(1, Dk)                         # biases stay f32
    bk_r = bk.reshape(1, Dk)

    scale = 1.0 / math.sqrt(Dk)
    kernel = functools.partial(_fused_attention_kernel, scale=scale)
    vmem_cap = _vmem_capacity_bytes()
    single_buffer_ok = [True]   # flipped if pipeline_mode=Buffered(1) rejects

    def forward(query_x):
        query_x = jnp.asarray(query_x, jnp.float32)
        B = query_x.shape[0]

        # Batch tile: <= max_batch_tile rows, multiple of 8 sublanes, sized so
        # there are >= 2 tiles whenever possible (so the outer "parallel" axis
        # keeps both v7x TensorCores busy).
        TB = max(8, min(max_batch_tile, _round_up(_cdiv(B, 2), 8)))
        n_tiles = _cdiv(B, TB)
        n_outer = 2 if n_tiles >= 2 else 1
        n_inner = _cdiv(n_tiles, n_outer)
        B_p = n_outer * n_inner * TB

        qx = query_x
        if B_p != B:
            qx = jnp.pad(qx, ((0, B_p - B), (0, 0)))   # padded rows sliced off
        qx = qx.astype(compute_dtype)

        # VMEM budget: single-buffered residents + keys scratch + double-
        # buffered query/output tiles + softmax temporaries + slack.
        resident = (2 * _vmem_tile_bytes(Din, Dk, itemsize)   # wq, wk
                    + 2 * _vmem_tile_bytes(1, Dk, 4)          # bq, bk
                    + _vmem_tile_bytes(S, Din, itemsize)      # search_x
                    + _vmem_tile_bytes(S, Dv, itemsize)       # values
                    + _vmem_tile_bytes(S, Dk, itemsize))      # keys scratch
        per_step = (2 * _vmem_tile_bytes(TB, Din, itemsize)   # qx (2 buffers)
                    + 2 * _vmem_tile_bytes(TB, Dv, 4)         # out (2 buffers)
                    + 3 * _vmem_tile_bytes(TB, S, 4)          # logits / e / p
                    + _vmem_tile_bytes(TB, Dk, 4))            # qkeys
        need = (resident + per_step) * 5 // 4 + (2 << 20)
        vmem_limit = int(min(max(need, 32 << 20), int(vmem_cap * 0.9)))
        # TODO(synk): when `need` exceeds ~0.9 * VMEM (large S, esp. v7x),
        # switch to the S-tiled online-softmax variant instead of clamping.

        cost = pl.CostEstimate(
            flops=2 * (S * Din * Dk + B_p * Din * Dk
                       + B_p * S * Dk + B_p * S * Dv),
            transcendentals=B_p * S,
            bytes_accessed=itemsize * (B_p * Din + 2 * Din * Dk
                                       + S * Din + S * Dv)
            + 4 * (2 * Dk + B_p * Dv))

        out_shape = jax.ShapeDtypeStruct((B_p, Dv), jnp.float32)
        grid = (n_outer, n_inner)

        def build(single_buffered):
            # Grid-invariant operands: single-buffered (index_map is constant,
            # double-buffering only wastes VMEM).
            res_kw = dict(pipeline_mode=pl.Buffered(1)) if single_buffered else {}
            qx_map = lambda o, i: (o * n_inner + i, 0)
            const_map = lambda o, i: (0, 0)
            return pl.pallas_call(
                kernel,
                out_shape=out_shape,
                grid=grid,
                in_specs=[
                    pl.BlockSpec((TB, Din), qx_map),               # query_x tile
                    pl.BlockSpec((Din, Dk), const_map, **res_kw),  # wq
                    pl.BlockSpec((1, Dk), const_map, **res_kw),    # bq
                    pl.BlockSpec((S, Din), const_map, **res_kw),   # search_x
                    pl.BlockSpec((Din, Dk), const_map, **res_kw),  # wk
                    pl.BlockSpec((1, Dk), const_map, **res_kw),    # bk
                    pl.BlockSpec((S, Dv), const_map, **res_kw),    # values
                ],
                out_specs=pl.BlockSpec((TB, Dv), qx_map),
                scratch_shapes=[pltpu.VMEM((S, Dk), compute_dtype)],  # keys
                compiler_params=pltpu.CompilerParams(
                    dimension_semantics=("parallel", "arbitrary"),
                    vmem_limit_bytes=vmem_limit),
                cost_estimate=cost,
                interpret=interpret,
            )

        args = (qx, wq_c, bq_r, sx_c, wk_c, bk_r, vy_c)
        if single_buffer_ok[0]:
            try:
                out = build(True)(*args)
            except Exception:
                # pipeline_mode=Buffered(1) unsupported on this JAX version /
                # backend: fall back to default double buffering (correct,
                # just uses ~2x resident VMEM).  Note: only effective when
                # this wrapper is called eagerly (as in the demo below).
                single_buffer_ok[0] = False
                out = build(False)(*args)
        else:
            out = build(False)(*args)

        # _ensure_key_shape gives n_keys == 1 for 2-D key outputs; the module
        # returns res with shape (batch, n_keys, d_value) when flatten=False.
        return out[:B].reshape(B, 1, Dv)

    return forward


def transformer_forward(query_x, search_x, search_y, wq, bq, wk, bk, *,
                        matmul_dtype=None, interpret=False):
    """One-shot convenience wrapper around make_transformer_forward."""
    fwd = make_transformer_forward(search_x, search_y, wq, bq, wk, bk,
                                   matmul_dtype=matmul_dtype,
                                   interpret=interpret)
    return fwd(query_x)


if __name__ == "__main__":
    B, S, Din, Dk, Dv = 8, 16, 32, 32, 8

    key = jax.random.PRNGKey(0)
    k1, k2, k3, k4, k5, k6, k7 = jax.random.split(key, 7)
    query_x = jax.random.normal(k1, (B, Din), jnp.float32)
    search_x = jax.random.normal(k2, (S, Din), jnp.float32)
    search_y = jax.random.normal(k3, (S, Dv), jnp.float32)
    # Deterministic synthetic parameters for key_module / query_module linears.
    wq = 0.1 * jax.random.normal(k4, (Din, Dk), jnp.float32)
    bq = 0.1 * jax.random.normal(k5, (Dk,), jnp.float32)
    wk = 0.1 * jax.random.normal(k6, (Din, Dk), jnp.float32)
    bk = 0.1 * jax.random.normal(k7, (Dk,), jnp.float32)

    forward = make_transformer_forward(search_x, search_y, wq, bq, wk, bk)
    out = forward(query_x)
    out = jax.block_until_ready(out)

    # Pure-JAX reference replicating the PyTorch forward (mask=None, flatten=False).
    keys_r = (search_x @ wk + bk)[:, None, :]            # (S, 1, Dk)
    qkeys_r = (query_x @ wq + bq)[:, None, :]            # (B, 1, Dk)
    logits_r = (qkeys_r[:, None, :, :] * keys_r[None, :, :, :]).sum(-1)
    logits_r = logits_r / (Dk ** 0.5)                    # (B, S, 1)
    p_r = jax.nn.softmax(logits_r, axis=1)               # softmax over search axis
    res_r = (p_r[:, :, :, None] * search_y[None, :, None, :]).sum(axis=1)

    assert out.shape == res_r.shape == (B, 1, Dv), (out.shape, res_r.shape)
    max_err = float(jnp.max(jnp.abs(out - res_r)))
    assert jnp.allclose(out, res_r, atol=1e-4, rtol=1e-4), max_err

    print("KERNEL_OK")
</pallas_src>

<mosaic_0001>
module attributes {stable_mosaic.version = 11 : i64} {
  func.func @_fused_attention_kernel(%arg0: i32, %arg1: i32, %arg2: memref<8x32xf32, #tpu.memory_space<vmem>>, %arg3: memref<32x32xf32, #tpu.memory_space<vmem>>, %arg4: memref<1x32xf32, #tpu.memory_space<vmem>>, %arg5: memref<16x32xf32, #tpu.memory_space<vmem>>, %arg6: memref<32x32xf32, #tpu.memory_space<vmem>>, %arg7: memref<1x32xf32, #tpu.memory_space<vmem>>, %arg8: memref<16x8xf32, #tpu.memory_space<vmem>>, %arg9: memref<8x8xf32, #tpu.memory_space<vmem>>, %arg10: memref<16x32xf32, #tpu.memory_space<vmem>>) attributes {dimension_semantics = [#tpu.dimension_semantics<parallel>, #tpu.dimension_semantics<arbitrary>], iteration_bounds = array<i64: 1, 1>, scalar_prefetch = 0 : i64, scratch_operands = 1 : i64, tpu.core_type = #tpu.core_type<tc>, window_params = [{transform_indices = @transform_0, window_bounds = array<i64: 8, 32>}, {pipeline_mode = #tpu.pipeline_mode<synchronous>, transform_indices = @transform_1, window_bounds = array<i64: 32, 32>}, {pipeline_mode = #tpu.pipeline_mode<synchronous>, transform_indices = @transform_2, window_bounds = array<i64: 1, 32>}, {pipeline_mode = #tpu.pipeline_mode<synchronous>, transform_indices = @transform_3, window_bounds = array<i64: 16, 32>}, {pipeline_mode = #tpu.pipeline_mode<synchronous>, transform_indices = @transform_4, window_bounds = array<i64: 32, 32>}, {pipeline_mode = #tpu.pipeline_mode<synchronous>, transform_indices = @transform_5, window_bounds = array<i64: 1, 32>}, {pipeline_mode = #tpu.pipeline_mode<synchronous>, transform_indices = @transform_6, window_bounds = array<i64: 16, 8>}, {transform_indices = @transform_7, window_bounds = array<i64: 8, 8>}]} {
    %c0_i32 = arith.constant 0 : i32
    %0 = arith.cmpi eq, %arg1, %c0_i32 : i32
    %1 = arith.extui %0 : i1 to i32
    %c0_i32_0 = arith.constant 0 : i32
    %2 = arith.cmpi ne, %1, %c0_i32_0 : i32
    scf.if %2 {
      %c0_18 = arith.constant 0 : index
      %c0_19 = arith.constant 0 : index
      %30 = vector.load %arg5[%c0_18, %c0_19] : memref<16x32xf32, #tpu.memory_space<vmem>>, vector<16x32xf32>
      %c0_20 = arith.constant 0 : index
      %c0_21 = arith.constant 0 : index
      %31 = vector.load %arg6[%c0_20, %c0_21] : memref<32x32xf32, #tpu.memory_space<vmem>>, vector<32x32xf32>
      %cst_22 = arith.constant dense<0.000000e+00> : vector<16x32xf32>
      %32 = tpu.matmul %30, %31, %cst_22 {dimension_numbers = #tpu.dot_dimension_numbers<[1], [0], [0], [1], [0, 0, 1, 1], [], []>} : vector<16x32xf32>, vector<32x32xf32>, vector<16x32xf32> -> vector<16x32xf32>
      %c0_23 = arith.constant 0 : index
      %c0_24 = arith.constant 0 : index
      %33 = vector.load %arg7[%c0_23, %c0_24] : memref<1x32xf32, #tpu.memory_space<vmem>>, vector<1x32xf32>
      %34 = vector.broadcast %33 : vector<1x32xf32> to vector<16x32xf32>
      %35 = arith.addf %32, %34 : vector<16x32xf32>
      %c0_25 = arith.constant 0 : index
      %c0_26 = arith.constant 0 : index
      %36 = vector.load %arg10[%c0_25, %c0_26] : memref<16x32xf32, #tpu.memory_space<vmem>>, vector<16x32xf32>
      tpu.vector_store %arg10[%c0_25, %c0_26], %35 {strides = array<i32>} : memref<16x32xf32, #tpu.memory_space<vmem>>, vector<16x32xf32>,
    } else {
    }
    %c0 = arith.constant 0 : index
    %c0_1 = arith.constant 0 : index
    %3 = vector.load %arg2[%c0, %c0_1] : memref<8x32xf32, #tpu.memory_space<vmem>>, vector<8x32xf32>
    %c0_2 = arith.constant 0 : index
    %c0_3 = arith.constant 0 : index
    %4 = vector.load %arg3[%c0_2, %c0_3] : memref<32x32xf32, #tpu.memory_space<vmem>>, vector<32x32xf32>
    %cst = arith.constant dense<0.000000e+00> : vector<8x32xf32>
    %5 = tpu.matmul %3, %4, %cst {dimension_numbers = #tpu.dot_dimension_numbers<[1], [0], [0], [1], [0, 0, 1, 1], [], []>} : vector<8x32xf32>, vector<32x32xf32>, vector<8x32xf32> -> vector<8x32xf32>
    %c0_4 = arith.constant 0 : index
    %c0_5 = arith.constant 0 : index
    %6 = vector.load %arg4[%c0_4, %c0_5] : memref<1x32xf32, #tpu.memory_space<vmem>>, vector<1x32xf32>
    %7 = vector.broadcast %6 : vector<1x32xf32> to vector<8x32xf32>
    %8 = arith.addf %5, %7 : vector<8x32xf32>
    %c0_6 = arith.constant 0 : index
    %c0_7 = arith.constant 0 : index
    %9 = vector.load %arg10[%c0_6, %c0_7] : memref<16x32xf32, #tpu.memory_space<vmem>>, vector<16x32xf32>
    %cst_8 = arith.constant dense<0.000000e+00> : vector<8x16xf32>
    %10 = tpu.matmul %8, %9, %cst_8 {dimension_numbers = #tpu.dot_dimension_numbers<[1], [1], [0], [0], [0, 0, 1, 0], [], []>} : vector<8x32xf32>, vector<16x32xf32>, vector<8x16xf32> -> vector<8x16xf32>
    %cst_9 = arith.constant 0.176776692 : f32
    %11 = vector.broadcast %cst_9 : f32 to vector<8x16xf32>
    %12 = arith.mulf %10, %11 : vector<8x16xf32>
    %cst_10 = arith.constant dense<0xFF800000> : vector<8xf32>
    %13 = vector.multi_reduction <maximumf>, %12, %cst_10 [1] : vector<8x16xf32> to vector<8xf32>
    %14 = vector.shape_cast %13 : vector<8xf32> to vector<8x1xf32>
    %15 = vector.broadcast %14 : vector<8x1xf32> to vector<8x16xf32>
    %16 = arith.subf %12, %15 : vector<8x16xf32>
    %17 = math.exp %16 : vector<8x16xf32>
    %cst_11 = arith.constant dense<0.000000e+00> : vector<8xf32>
    %18 = vector.multi_reduction <add>, %17, %cst_11 [1] : vector<8x16xf32> to vector<8xf32>
    %19 = vector.shape_cast %18 : vector<8xf32> to vector<8x1xf32>
    %20 = tpu.reciprocal %19 {approx = true} : vector<8x1xf32> -> vector<8x1xf32>
    %21 = arith.mulf %19, %20 : vector<8x1xf32>
    %cst_12 = arith.constant 2.000000e+00 : f32
    %22 = vector.broadcast %cst_12 : f32 to vector<8x1xf32>
    %23 = arith.subf %22, %21 : vector<8x1xf32>
    %24 = arith.mulf %20, %23 : vector<8x1xf32>
    %25 = vector.broadcast %24 : vector<8x1xf32> to vector<8x16xf32>
    %26 = arith.mulf %17, %25 : vector<8x16xf32>
    %c0_13 = arith.constant 0 : index
    %c0_14 = arith.constant 0 : index
    %27 = vector.load %arg8[%c0_13, %c0_14] : memref<16x8xf32, #tpu.memory_space<vmem>>, vector<16x8xf32>
    %cst_15 = arith.constant dense<0.000000e+00> : vector<8x8xf32>
    %28 = tpu.matmul %26, %27, %cst_15 {dimension_numbers = #tpu.dot_dimension_numbers<[1], [0], [0], [1], [0, 0, 1, 1], [], []>} : vector<8x16xf32>, vector<16x8xf32>, vector<8x8xf32> -> vector<8x8xf32>
    %c0_16 = arith.constant 0 : index
    %c0_17 = arith.constant 0 : index
    %29 = vector.load %arg9[%c0_16, %c0_17] : memref<8x8xf32, #tpu.memory_space<vmem>>, vector<8x8xf32>
    tpu.vector_store %arg9[%c0_16, %c0_17], %28 {strides = array<i32>} : memref<8x8xf32, #tpu.memory_space<vmem>>, vector<8x8xf32>,
    return
  }
  func.func @transform_0(%arg0: i32, %arg1: i32) -> (i32, i32) {
    %c1_i32 = arith.constant 1 : i32
    %0 = arith.muli %arg0, %c1_i32 : i32
    %1 = arith.addi %0, %arg1 : i32
    %c0_i32 = arith.constant 0 : i32
    %c0_i32_0 = arith.constant 0 : i32
    return %1, %c0_i32 : i32, i32
  }
  func.func @transform_1(%arg0: i32, %arg1: i32) -> (i32, i32) {
    %c0_i32 = arith.constant 0 : i32
    %c0_i32_0 = arith.constant 0 : i32
    %c0_i32_1 = arith.constant 0 : i32
    return %c0_i32, %c0_i32_0 : i32, i32
  }
  func.func @transform_2(%arg0: i32, %arg1: i32) -> (i32, i32) {
    %c0_i32 = arith.constant 0 : i32
    %c0_i32_0 = arith.constant 0 : i32
    %c0_i32_1 = arith.constant 0 : i32
    return %c0_i32, %c0_i32_0 : i32, i32
  }
  func.func @transform_3(%arg0: i32, %arg1: i32) -> (i32, i32) {
    %c0_i32 = arith.constant 0 : i32
    %c0_i32_0 = arith.constant 0 : i32
    %c0_i32_1 = arith.constant 0 : i32
    return %c0_i32, %c0_i32_0 : i32, i32
  }
  func.func @transform_4(%arg0: i32, %arg1: i32) -> (i32, i32) {
    %c0_i32 = arith.constant 0 : i32
    %c0_i32_0 = arith.constant 0 : i32
    %c0_i32_1 = arith.constant 0 : i32
    return %c0_i32, %c0_i32_0 : i32, i32
  }
  func.func @transform_5(%arg0: i32, %arg1: i32) -> (i32, i32) {
    %c0_i32 = arith.constant 0 : i32
    %c0_i32_0 = arith.constant 0 : i32
    %c0_i32_1 = arith.constant 0 : i32
    return %c0_i32, %c0_i32_0 : i32, i32
  }
  func.func @transform_6(%arg0: i32, %arg1: i32) -> (i32, i32) {
    %c0_i32 = arith.constant 0 : i32
    %c0_i32_0 = arith.constant 0 : i32
    %c0_i32_1 = arith.constant 0 : i32
    return %c0_i32, %c0_i32_0 : i32, i32
  }
  func.func @transform_7(%arg0: i32, %arg1: i32) -> (i32, i32) {
    %c1_i32 = arith.constant 1 : i32
    %0 = arith.muli %arg0, %c1_i32 : i32
    %1 = arith.addi %0, %arg1 : i32
    %c0_i32 = arith.constant 0 : i32
    %c0_i32_0 = arith.constant 0 : i32
    return %1, %c0_i32 : i32, i32
  }
}

module attributes {stable_mosaic.version = 11 : i64} {
  func.func @_fused_attention_kernel(%arg0: i32, %arg1: i32, %arg2: memref<8x32xf32, #tpu.memory_space<vmem>>, %arg3: memref<32x32xf32, #tpu.memory_space<vmem>>, %arg4: memref<1x32xf32, #tpu.memory_space<vmem>>, %arg5: memref<16x32xf32, #tpu.memory_space<vmem>>, %arg6: memref<32x32xf32, #tpu.memory_space<vmem>>, %arg7: memref<1x32xf32, #tpu.memory_space<vmem>>, %arg8: memref<16x8xf32, #tpu.memory_space<vmem>>, %arg9: memref<8x8xf32, #tpu.memory_space<vmem>>, %arg10: memref<16x32xf32, #tpu.memory_space<vmem>>) attributes {dimension_semantics = [#tpu.dimension_semantics<parallel>, #tpu.dimension_semantics<arbitrary>], iteration_bounds = array<i64: 1, 1>, scalar_prefetch = 0 : i64, scratch_operands = 1 : i64, tpu.core_type = #tpu.core_type<tc>, window_params = [{transform_indices = @transform_0, window_bounds = array<i64: 8, 32>}, {pipeline_mode = #tpu.pipeline_mode<synchronous>, transform_indices = @transform_1, window_bounds = array<i64: 32, 32>}, {pipeline_mode = #tpu.pipeline_mode<synchronous>, transform_indices = @transform_2, window_bounds = array<i64: 1, 32>}, {pipeline_mode = #tpu.pipeline_mode<synchronous>, transform_indices = @transform_3, window_bounds = array<i64: 16, 32>}, {pipeline_mode = #tpu.pipeline_mode<synchronous>, transform_indices = @transform_4, window_bounds = array<i64: 32, 32>}, {pipeline_mode = #tpu.pipeline_mode<synchronous>, transform_indices = @transform_5, window_bounds = array<i64: 1, 32>}, {pipeline_mode = #tpu.pipeline_mode<synchronous>, transform_indices = @transform_6, window_bounds = array<i64: 16, 8>}, {transform_indices = @transform_7, window_bounds = array<i64: 8, 8>}]} {
    %c0_i32 = arith.constant 0 : i32
    %0 = arith.cmpi eq, %arg1, %c0_i32 : i32
    %1 = arith.extui %0 : i1 to i32
    %c0_i32_0 = arith.constant 0 : i32
    %2 = arith.cmpi ne, %1, %c0_i32_0 : i32
    scf.if %2 {
      %c0_18 = arith.constant 0 : index
      %c0_19 = arith.constant 0 : index
      %30 = vector.load %arg5[%c0_18, %c0_19] : memref<16x32xf32, #tpu.memory_space<vmem>>, vector<16x32xf32>
      %c0_20 = arith.constant 0 : index
      %c0_21 = arith.constant 0 : index
      %31 = vector.load %arg6[%c0_20, %c0_21] : memref<32x32xf32, #tpu.memory_space<vmem>>, vector<32x32xf32>
      %cst_22 = arith.constant dense<0.000000e+00> : vector<16x32xf32>
      %32 = tpu.matmul %30, %31, %cst_22 {dimension_numbers = #tpu.dot_dimension_numbers<[1], [0], [0], [1], [0, 0, 1, 1], [], []>} : vector<16x32xf32>, vector<32x32xf32>, vector<16x32xf32> -> vector<16x32xf32>
      %c0_23 = arith.constant 0 : index
      %c0_24 = arith.constant 0 : index
      %33 = vector.load %arg7[%c0_23, %c0_24] : memref<1x32xf32, #tpu.memory_space<vmem>>, vector<1x32xf32>
      %34 = vector.broadcast %33 : vector<1x32xf32> to vector<16x32xf32>
      %35 = arith.addf %32, %34 : vector<16x32xf32>
      %c0_25 = arith.constant 0 : index
      %c0_26 = arith.constant 0 : index
      %36 = vector.load %arg10[%c0_25, %c0_26] : memref<16x32xf32, #tpu.memory_space<vmem>>, vector<16x32xf32>
      tpu.vector_store %arg10[%c0_25, %c0_26], %35 {strides = array<i32>} : memref<16x32xf32, #tpu.memory_space<vmem>>, vector<16x32xf32>,
    } else {
    }
    %c0 = arith.constant 0 : index
    %c0_1 = arith.constant 0 : index
    %3 = vector.load %arg2[%c0, %c0_1] : memref<8x32xf32, #tpu.memory_space<vmem>>, vector<8x32xf32>
    %c0_2 = arith.constant 0 : index
    %c0_3 = arith.constant 0 : index
    %4 = vector.load %arg3[%c0_2, %c0_3] : memref<32x32xf32, #tpu.memory_space<vmem>>, vector<32x32xf32>
    %cst = arith.constant dense<0.000000e+00> : vector<8x32xf32>
    %5 = tpu.matmul %3, %4, %cst {dimension_numbers = #tpu.dot_dimension_numbers<[1], [0], [0], [1], [0, 0, 1, 1], [], []>} : vector<8x32xf32>, vector<32x32xf32>, vector<8x32xf32> -> vector<8x32xf32>
    %c0_4 = arith.constant 0 : index
    %c0_5 = arith.constant 0 : index
    %6 = vector.load %arg4[%c0_4, %c0_5] : memref<1x32xf32, #tpu.memory_space<vmem>>, vector<1x32xf32>
    %7 = vector.broadcast %6 : vector<1x32xf32> to vector<8x32xf32>
    %8 = arith.addf %5, %7 : vector<8x32xf32>
    %c0_6 = arith.constant 0 : index
    %c0_7 = arith.constant 0 : index
    %9 = vector.load %arg10[%c0_6, %c0_7] : memref<16x32xf32, #tpu.memory_space<vmem>>, vector<16x32xf32>
    %cst_8 = arith.constant dense<0.000000e+00> : vector<8x16xf32>
    %10 = tpu.matmul %8, %9, %cst_8 {dimension_numbers = #tpu.dot_dimension_numbers<[1], [1], [0], [0], [0, 0, 1, 0], [], []>} : vector<8x32xf32>, vector<16x32xf32>, vector<8x16xf32> -> vector<8x16xf32>
    %cst_9 = arith.constant 0.176776692 : f32
    %11 = vector.broadcast %cst_9 : f32 to vector<8x16xf32>
    %12 = arith.mulf %10, %11 : vector<8x16xf32>
    %cst_10 = arith.constant dense<0xFF800000> : vector<8xf32>
    %13 = vector.multi_reduction <maximumf>, %12, %cst_10 [1] : vector<8x16xf32> to vector<8xf32>
    %14 = vector.shape_cast %13 : vector<8xf32> to vector<8x1xf32>
    %15 = vector.broadcast %14 : vector<8x1xf32> to vector<8x16xf32>
    %16 = arith.subf %12, %15 : vector<8x16xf32>
    %17 = math.exp %16 : vector<8x16xf32>
    %cst_11 = arith.constant dense<0.000000e+00> : vector<8xf32>
    %18 = vector.multi_reduction <add>, %17, %cst_11 [1] : vector<8x16xf32> to vector<8xf32>
    %19 = vector.shape_cast %18 : vector<8xf32> to vector<8x1xf32>
    %20 = tpu.reciprocal %19 {approx = true} : vector<8x1xf32> -> vector<8x1xf32>
    %21 = arith.mulf %19, %20 : vector<8x1xf32>
    %cst_12 = arith.constant 2.000000e+00 : f32
    %22 = vector.broadcast %cst_12 : f32 to vector<8x1xf32>
    %23 = arith.subf %22, %21 : vector<8x1xf32>
    %24 = arith.mulf %20, %23 : vector<8x1xf32>
    %25 = vector.broadcast %24 : vector<8x1xf32> to vector<8x16xf32>
    %26 = arith.mulf %17, %25 : vector<8x16xf32>
    %c0_13 = arith.constant 0 : index
    %c0_14 = arith.constant 0 : index
    %27 = vector.load %arg8[%c0_13, %c0_14] : memref<16x8xf32, #tpu.memory_space<vmem>>, vector<16x8xf32>
    %cst_15 = arith.constant dense<0.000000e+00> : vector<8x8xf32>
    %28 = tpu.matmul %26, %27, %cst_15 {dimension_numbers = #tpu.dot_dimension_numbers<[1], [0], [0], [1], [0, 0, 1, 1], [], []>} : vector<8x16xf32>, vector<16x8xf32>, vector<8x8xf32> -> vector<8x8xf32>
    %c0_16 = arith.constant 0 : index
    %c0_17 = arith.constant 0 : index
    %29 = vector.load %arg9[%c0_16, %c0_17] : memref<8x8xf32, #tpu.memory_space<vmem>>, vector<8x8xf32>
    tpu.vector_store %arg9[%c0_16, %c0_17], %28 {strides = array<i32>} : memref<8x8xf32, #tpu.memory_space<vmem>>, vector<8x8xf32>,
    return
  }
  func.func @transform_0(%arg0: i32, %arg1: i32) -> (i32, i32) {
    %c1_i32 = arith.constant 1 : i32
    %0 = arith.muli %arg0, %c1_i32 : i32
    %1 = arith.addi %0, %arg1 : i32
    %c0_i32 = arith.constant 0 : i32
    %c0_i32_0 = arith.constant 0 : i32
    return %1, %c0_i32 : i32, i32
  }
  func.func @transform_1(%arg0: i32, %arg1: i32) -> (i32, i32) {
    %c0_i32 = arith.constant 0 : i32
    %c0_i32_0 = arith.constant 0 : i32
    %c0_i32_1 = arith.constant 0 : i32
    return %c0_i32, %c0_i32_0 : i32, i32
  }
  func.func @transform_2(%arg0: i32, %arg1: i32) -> (i32, i32) {
    %c0_i32 = arith.constant 0 : i32
    %c0_i32_0 = arith.constant 0 : i32
    %c0_i32_1 = arith.constant 0 : i32
    return %c0_i32, %c0_i32_0 : i32, i32
  }
  func.func @transform_3(%arg0: i32, %arg1: i32) -> (i32, i32) {
    %c0_i32 = arith.constant 0 : i32
    %c0_i32_0 = arith.constant 0 : i32
    %c0_i32_1 = arith.constant 0 : i32
    return %c0_i32, %c0_i32_0 : i32, i32
  }
  func.func @transform_4(%arg0: i32, %arg1: i32) -> (i32, i32) {
    %c0_i32 = arith.constant 0 : i32
    %c0_i32_0 = arith.constant 0 : i32
    %c0_i32_1 = arith.constant 0 : i32
    return %c0_i32, %c0_i32_0 : i32, i32
  }
  func.func @transform_5(%arg0: i32, %arg1: i32) -> (i32, i32) {
    %c0_i32 = arith.constant 0 : i32
    %c0_i32_0 = arith.constant 0 : i32
    %c0_i32_1 = arith.constant 0 : i32
    return %c0_i32, %c0_i32_0 : i32, i32
  }
  func.func @transform_6(%arg0: i32, %arg1: i32) -> (i32, i32) {
    %c0_i32 = arith.constant 0 : i32
    %c0_i32_0 = arith.constant 0 : i32
    %c0_i32_1 = arith.constant 0 : i32
    return %c0_i32, %c0_i32_0 : i32, i32
  }
  func.func @transform_7(%arg0: i32, %arg1: i32) -> (i32, i32) {
    %c1_i32 = arith.constant 1 : i32
    %0 = arith.muli %arg0, %c1_i32 : i32
    %1 = arith.addi %0, %arg1 : i32
    %c0_i32 = arith.constant 0 : i32
    %c0_i32_0 = arith.constant 0 : i32
    return %1, %c0_i32 : i32, i32
  }
}

</mosaic_0001>

<bundles_post_ra>
// kernel: tpu_custom_call.1
= control target key start
LH: loop header
LB: loop body
LE: loop exit
PB: predicated region body
PF: predicated region fallthrough
CT: control target
= control target key end

     0   :  { %12 = vsyncpa [#allocation4], 0  ;;  %s439_s0 = inlined_call_operand.vmem [shape: f32[8,32], index: 0, kind: input, shape index: {}]   ;;  %s440_s1 = inlined_call_operand.hbm [shape: f32[32,32], index: 1, kind: input, shape index: {}]   ;;  %s441_s2 = inlined_call_operand.vmem [shape: f32[1,32], index: 2, kind: input, shape index: {}]   ;;  %s442_s3 = inlined_call_operand.vmem [shape: f32[16,32], index: 3, kind: input, shape index: {}]   ;;  %s443_s4 = inlined_call_operand.hbm [shape: f32[32,32], index: 4, kind: input, shape index: {}]   ;;  %s444_s5 = inlined_call_operand.vmem [shape: f32[1,32], index: 5, kind: input, shape index: {}]   ;;  %s445_s6 = inlined_call_operand.vmem [shape: f32[16,8], index: 6, kind: input, shape index: {}]   ;;  %s446_s7 = inlined_call_operand.hbm [shape: f32[8,8], index: 7, kind: output, shape index: {}]  }
   0x1   :  { %13 = vsyncpa [#allocation7], 0 }
   0x2   :  { %14 = vsyncpa [#allocation5], 0  ;;  %s27_s26 = sshll.u32 %s440_s1, 4  ;;  %s353_s27 = smov [#allocation3]   ;;  %s28_s26 = int_to_ptr.hbm [resolvable:$true] %s27_s26 }
   0x3   :  { %s29_s28 = sshll.u32 %s353_s27, 4  ;;  %s44_s8 = sshll.u32 %s443_s4, 4  ;;  %s30_s28 = int_to_ptr.vmem [resolvable:$true] %s29_s28  ;;  %s45_s8 = int_to_ptr.hbm [resolvable:$true] %s44_s8 }
   0x4   :  { %s354_s9 = smov 128   ;;  %s355_s10 = smov 8  }
   0x5   :  { %35 = dma.hbm_to_vmem [thread:$0]  %s28_s26, 512, %s30_s28, [#allocation4], %s354_s9, %s354_s9, %s355_s10  }
   0x6   :  { %s356_s11 = smov [#allocation6]  }
   0x7   :  { %s46_s12 = sshll.u32 %s356_s11, 4  ;;  %s47_s12 = int_to_ptr.vmem [resolvable:$true] %s46_s12 }
   0x8   :  { %52 = dma.hbm_to_vmem [thread:$0]  %s45_s8, 512, %s47_s12, [#allocation7], %s354_s9, %s354_s9, %s355_s10  }
   0x9   :  { %347 = dma.done.wait [#allocation4], 512  }
   0xa   :  { %348 = vsyncadd [#allocation4], 4294966784 }
   0xb   :  { %349 = dma.done.wait [#allocation7], 512  }
   0xc   :  { %350 = vsyncadd [#allocation7], 4294966784  ;;  %v86_v0 = vld [vmem:[#allocation6 + $0x18] sm:$0xff]  ;;  %v85_v1 = vld [vmem:[#allocation6 + $0x10] sm:$0xff]  ;;  %vm91_vm0 = vcmask 261120   ;;  %vm188_vm1 = vcmask 130048  }
   0xd   :  { %110 = vmatpush.msra.mxu0 %v86_v0  ;;  %v84_v2 = vld [vmem:[#allocation6 + $0x8] sm:$0xff]  ;;  %v127_v3 = vld [vmem:[#allocation3 + $0x18] sm:$0xff]  ;;  %v126_v4 = vld [vmem:[#allocation3 + $0x10] sm:$0xff]  ;;  %s357_s21 = smov [#allocation8]   ;;  %s240_s25 = sshll.u32 %s446_s7, 4  ;;  %vm228_vm2 = vcmask 64512   ;;  %s241_s25 = int_to_ptr.hbm [resolvable:$true] %s240_s25 }
   0xe   :  { %148 = vmatpush.msra.mxu1 %v127_v3  ;;  %v83_v5 = vld [vmem:[#allocation6] sm:$0xff]  ;;  %v125_v6 = vld [vmem:[#allocation3 + $0x8] sm:$0xff]  ;;  %v81_v7 = vld [vmem:[%s442_s3] sm:$0xff]  ;;  %s238_s22 = sshll.u32 %s357_s21, 4  ;;  %s239_s22 = int_to_ptr.vmem [resolvable:$true] %s238_s22 }
   0xf   :  { %111 = vmatpush.msra.mxu0 %v85_v1  ;;  %v124_v8 = vld [vmem:[#allocation3] sm:$0xff]  ;;  %v123_v9 = vld [vmem:[%s439_s0] sm:$0xff]  ;;  %v82_v10 = vld [vmem:[%s442_s3 + $0x8] sm:$0xff] }
  0x10   :  { %149 = vmatpush.msra.mxu1 %v126_v4  ;;  %v269_v11 = vld [vmem:[%s444_s5] ss:$0 sm:$0xff]  ;;  %v204_v29 = vld [vmem:[%s445_s6 + $0x8] sm:$0xff] }
  0x11   :  { %112 = vmatpush.msra.mxu0 %v84_v2  ;;  %v270_v17 = vld [vmem:[%s441_s2] ss:$0 sm:$0xff]  ;;  %222 = vmatpush.msra.mxu3 %v204_v29 }
  0x12   :  { %150 = vmatpush.msra.mxu1 %v125_v6  ;;  %v203_v30 = vld [vmem:[%s445_s6] sm:$0xff] }
  0x13   :  { %113 = vmatpush.msra.mxu0 %v83_v5  ;;  %223 = vmatpush.msra.mxu3 %v203_v30 }
  0x14   :  { %257 = vmatmul.msk.f32.vlgmr.msra.gmra.mxu0 %vm91_vm0, %v81_v7  ;;  %151 = vmatpush.msra.mxu1 %v124_v8 }
  0x15   :  { %259 = vmatmul.msk.f32.vlgmr.msra.gmra.mxu1 %vm91_vm0, %v123_v9 }
  0x1c   :  { %258 = vmatmul.msk.f32.gmra.mxu0 %vm91_vm0, %v82_v10 }
  0x91   :  { %v115_v12 = vpop.f32.mrf.mxu0 }
  0x92   :  { %v116_v13 = vadd.f32 %v269_v11, %v115_v12  ;;  %v153_v18 = vpop.f32.mrf.mxu1 }
  0x93   :  { %v154_v19 = vadd.f32 %v270_v17, %v153_v18 }
  0x94   :  { %121 = vst.msk [vmem:[#allocation2] sm:$0xff] %vm91_vm0, %v116_v13 }
  0x99   :  { %v118_v14 = vpop.f32.mrf.mxu0 }
  0x9a   :  { %v119_v15 = vadd.f32 %v269_v11, %v118_v14 }
  0x9b   :  { %v156_v20 = vld [vmem:[#allocation2] sm:$0xff] }
  0x9c   :  { %122 = vst.msk [vmem:[#allocation2 + $0x8] sm:$0xff] %vm91_vm0, %v119_v15 }
  0xa3   :  { %v157_v16 = vld [vmem:[#allocation2 + $0x8] sm:$0xff] }
  0xa4   :  { %260 = vmatpush.xpose.msk.msra.mxu2 %vm91_vm0, %v157_v16 }
  0xa8   :  { %261 = vmatpush.xpose.msk.msra.mxu2 %vm91_vm0, %v156_v20 }
  0xab   :  { %262 = vmatmul.msk.f32.vlgmr.msra.gmra.mxu2 %vm91_vm0, %v154_v19 }
 0x12e   :  { %v184_v21 = vpop.f32.mrf.mxu2 }
 0x12f   :  { %v187_v22 = vmul.f32 0.17677669, %v184_v21 }
 0x131   :  { %v189_v23 = vsel %vm188_vm1, %v187_v22, -inf }
 0x132   :  { %190 = vmax.xlane.f32.xlu0 %v189_v23 }
 0x1a5   :  { %v191_v24 = vpop.xlane.xlu0 %190 }
 0x1a6   :  { %v192_v25 = vsub.f32 %v187_v22, %v191_v24 }
 0x1a8   :  { %v193_v26 = vmul.f32 1.442695, %v192_v25 }
 0x1aa   :  { %271 = vpow2.f32 %v193_v26 }
 0x1b0   :  { %v272_v27 = vpop.eup %271 }
 0x1b1   :  { %v195_v28 = vsel %vm188_vm1, %v272_v27, 0.0 }
 0x1b2   :  { %196 = vadd.xlane.f32.xlu0 %v195_v28 }
 0x225   :  { %v197_v31 = vpop.xlane.xlu0 %196 }
 0x226   :  { %273 = vrcp.f32 %v197_v31 }
 0x22c   :  { %v274_v32 = vpop.eup %273 }
 0x22d   :  { %v199_v33 = vmul.f32 %v274_v32, %v197_v31 }
 0x22f   :  { %v200_v34 = vsub.f32 2.0, %v199_v33 }
 0x231   :  { %v201_v35 = vmul.f32 %v274_v32, %v200_v34 }
 0x233   :  { %v202_v36 = vmul.f32 %v272_v27, %v201_v35 }
 0x235   :  { %263 = vmatmul.msk.f32.vlgmr.msra.gmra.mxu3 %vm188_vm1, %v202_v36 }
 0x2b8   :  { %v225_v37 = vpop.f32.mrf.mxu3 }
 0x2b9   :  { %229 = vst.msk [vmem:[#allocation8] sm:$0xff] %vm228_vm2, %v225_v37 }
 0x2ba   :  { %243 = dma.vmem_to_hbm [thread:$0]  %s239_s22, 128, %s241_s25, [#allocation5]  }
 0x2bb   :  { %351 = dma.done.wait [#allocation5], 128  }
 0x2bc   :  { %352 = vsyncadd [#allocation5], 4294967168 }
 0x2bd   :  { %248 = vsyncpa [#allocation4], 1 }
 0x2be   :  { %249 = vsyncpa [#allocation7], 1 }
 0x2bf   :  { %250 = vsyncpa [#allocation5], 1 }

// kernel: tpu_custom_call.1
= control target key start
LH: loop header
LB: loop body
LE: loop exit
PB: predicated region body
PF: predicated region fallthrough
CT: control target
= control target key end

     0   :  { %12 = vsyncpa [#allocation4], 0  ;;  %s439_s0 = inlined_call_operand.vmem [shape: f32[8,32], index: 0, kind: input, shape index: {}]   ;;  %s440_s1 = inlined_call_operand.hbm [shape: f32[32,32], index: 1, kind: input, shape index: {}]   ;;  %s441_s2 = inlined_call_operand.vmem [shape: f32[1,32], index: 2, kind: input, shape index: {}]   ;;  %s442_s3 = inlined_call_operand.vmem [shape: f32[16,32], index: 3, kind: input, shape index: {}]   ;;  %s443_s4 = inlined_call_operand.hbm [shape: f32[32,32], index: 4, kind: input, shape index: {}]   ;;  %s444_s5 = inlined_call_operand.vmem [shape: f32[1,32], index: 5, kind: input, shape index: {}]   ;;  %s445_s6 = inlined_call_operand.vmem [shape: f32[16,8], index: 6, kind: input, shape index: {}]   ;;  %s446_s7 = inlined_call_operand.hbm [shape: f32[8,8], index: 7, kind: output, shape index: {}]  }
   0x1   :  { %13 = vsyncpa [#allocation7], 0 }
   0x2   :  { %14 = vsyncpa [#allocation5], 0  ;;  %s27_s26 = sshll.u32 %s440_s1, 4  ;;  %s353_s27 = smov [#allocation3]   ;;  %s28_s26 = int_to_ptr.hbm [resolvable:$true] %s27_s26 }
   0x3   :  { %s29_s28 = sshll.u32 %s353_s27, 4  ;;  %s44_s8 = sshll.u32 %s443_s4, 4  ;;  %s30_s28 = int_to_ptr.vmem [resolvable:$true] %s29_s28  ;;  %s45_s8 = int_to_ptr.hbm [resolvable:$true] %s44_s8 }
   0x4   :  { %s354_s9 = smov 128   ;;  %s355_s10 = smov 8  }
   0x5   :  { %35 = dma.hbm_to_vmem [thread:$0]  %s28_s26, 512, %s30_s28, [#allocation4], %s354_s9, %s354_s9, %s355_s10  }
   0x6   :  { %s356_s11 = smov [#allocation6]  }
   0x7   :  { %s46_s12 = sshll.u32 %s356_s11, 4  ;;  %s47_s12 = int_to_ptr.vmem [resolvable:$true] %s46_s12 }
   0x8   :  { %52 = dma.hbm_to_vmem [thread:$0]  %s45_s8, 512, %s47_s12, [#allocation7], %s354_s9, %s354_s9, %s355_s10  }
   0x9   :  { %347 = dma.done.wait [#allocation4], 512  }
   0xa   :  { %348 = vsyncadd [#allocation4], 4294966784 }
   0xb   :  { %349 = dma.done.wait [#allocation7], 512  }
   0xc   :  { %350 = vsyncadd [#allocation7], 4294966784  ;;  %v86_v0 = vld [vmem:[#allocation6 + $0x18] sm:$0xff]  ;;  %v85_v1 = vld [vmem:[#allocation6 + $0x10] sm:$0xff]  ;;  %vm91_vm0 = vcmask 261120   ;;  %vm188_vm1 = vcmask 130048  }
   0xd   :  { %110 = vmatpush.msra.mxu0 %v86_v0  ;;  %v84_v2 = vld [vmem:[#allocation6 + $0x8] sm:$0xff]  ;;  %v127_v3 = vld [vmem:[#allocation3 + $0x18] sm:$0xff]  ;;  %v126_v4 = vld [vmem:[#allocation3 + $0x10] sm:$0xff]  ;;  %s357_s21 = smov [#allocation8]   ;;  %s240_s25 = sshll.u32 %s446_s7, 4  ;;  %vm228_vm2 = vcmask 64512   ;;  %s241_s25 = int_to_ptr.hbm [resolvable:$true] %s240_s25 }
   0xe   :  { %148 = vmatpush.msra.mxu1 %v127_v3  ;;  %v83_v5 = vld [vmem:[#allocation6] sm:$0xff]  ;;  %v125_v6 = vld [vmem:[#allocation3 + $0x8] sm:$0xff]  ;;  %v81_v7 = vld [vmem:[%s442_s3] sm:$0xff]  ;;  %s238_s22 = sshll.u32 %s357_s21, 4  ;;  %s239_s22 = int_to_ptr.vmem [resolvable:$true] %s238_s22 }
   0xf   :  { %111 = vmatpush.msra.mxu0 %v85_v1  ;;  %v124_v8 = vld [vmem:[#allocation3] sm:$0xff]  ;;  %v123_v9 = vld [vmem:[%s439_s0] sm:$0xff]  ;;  %v82_v10 = vld [vmem:[%s442_s3 + $0x8] sm:$0xff] }
  0x10   :  { %149 = vmatpush.msra.mxu1 %v126_v4  ;;  %v269_v11 = vld [vmem:[%s444_s5] ss:$0 sm:$0xff]  ;;  %v204_v29 = vld [vmem:[%s445_s6 + $0x8] sm:$0xff] }
  0x11   :  { %112 = vmatpush.msra.mxu0 %v84_v2  ;;  %v270_v17 = vld [vmem:[%s441_s2] ss:$0 sm:$0xff]  ;;  %222 = vmatpush.msra.mxu3 %v204_v29 }
  0x12   :  { %150 = vmatpush.msra.mxu1 %v125_v6  ;;  %v203_v30 = vld [vmem:[%s445_s6] sm:$0xff] }
  0x13   :  { %113 = vmatpush.msra.mxu0 %v83_v5  ;;  %223 = vmatpush.msra.mxu3 %v203_v30 }
  0x14   :  { %257 = vmatmul.msk.f32.vlgmr.msra.gmra.mxu0 %vm91_vm0, %v81_v7  ;;  %151 = vmatpush.msra.mxu1 %v124_v8 }
  0x15   :  { %259 = vmatmul.msk.f32.vlgmr.msra.gmra.mxu1 %vm91_vm0, %v123_v9 }
  0x1c   :  { %258 = vmatmul.msk.f32.gmra.mxu0 %vm91_vm0, %v82_v10 }
  0x91   :  { %v115_v12 = vpop.f32.mrf.mxu0 }
  0x92   :  { %v116_v13 = vadd.f32 %v269_v11, %v115_v12  ;;  %v153_v18 = vpop.f32.mrf.mxu1 }
  0x93   :  { %v154_v19 = vadd.f32 %v270_v17, %v153_v18 }
  0x94   :  { %121 = vst.msk [vmem:[#allocation2] sm:$0xff] %vm91_vm0, %v116_v13 }
  0x99   :  { %v118_v14 = vpop.f32.mrf.mxu0 }
  0x9a   :  { %v119_v15 = vadd.f32 %v269_v11, %v118_v14 }
  0x9b   :  { %v156_v20 = vld [vmem:[#allocation2] sm:$0xff] }
  0x9c   :  { %122 = vst.msk [vmem:[#allocation2 + $0x8] sm:$0xff] %vm91_vm0, %v119_v15 }
  0xa3   :  { %v157_v16 = vld [vmem:[#allocation2 + $0x8] sm:$0xff] }
  0xa4   :  { %260 = vmatpush.xpose.msk.msra.mxu2 %vm91_vm0, %v157_v16 }
  0xa8   :  { %261 = vmatpush.xpose.msk.msra.mxu2 %vm91_vm0, %v156_v20 }
  0xab   :  { %262 = vmatmul.msk.f32.vlgmr.msra.gmra.mxu2 %vm91_vm0, %v154_v19 }
 0x12e   :  { %v184_v21 = vpop.f32.mrf.mxu2 }
 0x12f   :  { %v187_v22 = vmul.f32 0.17677669, %v184_v21 }
 0x131   :  { %v189_v23 = vsel %vm188_vm1, %v187_v22, -inf }
 0x132   :  { %190 = vmax.xlane.f32.xlu0 %v189_v23 }
 0x1a5   :  { %v191_v24 = vpop.xlane.xlu0 %190 }
 0x1a6   :  { %v192_v25 = vsub.f32 %v187_v22, %v191_v24 }
 0x1a8   :  { %v193_v26 = vmul.f32 1.442695, %v192_v25 }
 0x1aa   :  { %271 = vpow2.f32 %v193_v26 }
 0x1b0   :  { %v272_v27 = vpop.eup %271 }
 0x1b1   :  { %v195_v28 = vsel %vm188_vm1, %v272_v27, 0.0 }
 0x1b2   :  { %196 = vadd.xlane.f32.xlu0 %v195_v28 }
 0x225   :  { %v197_v31 = vpop.xlane.xlu0 %196 }
 0x226   :  { %273 = vrcp.f32 %v197_v31 }
 0x22c   :  { %v274_v32 = vpop.eup %273 }
 0x22d   :  { %v199_v33 = vmul.f32 %v274_v32, %v197_v31 }
 0x22f   :  { %v200_v34 = vsub.f32 2.0, %v199_v33 }
 0x231   :  { %v201_v35 = vmul.f32 %v274_v32, %v200_v34 }
 0x233   :  { %v202_v36 = vmul.f32 %v272_v27, %v201_v35 }
 0x235   :  { %263 = vmatmul.msk.f32.vlgmr.msra.gmra.mxu3 %vm188_vm1, %v202_v36 }
 0x2b8   :  { %v225_v37 = vpop.f32.mrf.mxu3 }
 0x2b9   :  { %229 = vst.msk [vmem:[#allocation8] sm:$0xff] %vm228_vm2, %v225_v37 }
 0x2ba   :  { %243 = dma.vmem_to_hbm [thread:$0]  %s239_s22, 128, %s241_s25, [#allocation5]  }
 0x2bb   :  { %351 = dma.done.wait [#allocation5], 128  }
 0x2bc   :  { %352 = vsyncadd [#allocation5], 4294967168 }
 0x2bd   :  { %248 = vsyncpa [#allocation4], 1 }
 0x2be   :  { %249 = vsyncpa [#allocation7], 1 }
 0x2bf   :  { %250 = vsyncpa [#allocation5], 1 }

</bundles_post_ra>
